<compile_context>
chip_gen: v7x
topology: tpu7x:2x2x1
jax: 0.10.0
libtpu: 0.0.40
codegen_flags: <defaults>
</compile_context>

<pallas_src>
import jax
import jax.numpy as jnp
from jax.experimental import pallas as pl
from jax.experimental.pallas import tpu as pltpu

_LANE = 128  # TPU lane width: keep the kernel's output last dim a multiple of this.


def _two_head_fused_kernel(x_ref, w_ref, o_ref):
    # x_ref: (B, K)   w_ref: (K, Npad)   o_ref: (B, Npad)
    # Single MXU matmul with f32 accumulation; weights already in (K, N) layout,
    # so no transpose is materialized inside the kernel.
    o_ref[...] = jnp.dot(
        x_ref[...], w_ref[...], preferred_element_type=jnp.float32
    ).astype(o_ref.dtype)


def two_head_linear(x, w1, w2):
    """Computes (x @ w1.T, x @ w2.T) with a single fused Pallas kernel.

    Args:
      x:  (in_features,) or (B, in_features)
      w1: (out_features, in_features)
      w2: (out_features, in_features)
    Returns:
      tuple of two arrays, each (out_features,) or (B, out_features).
    """
    squeeze = x.ndim == 1
    x2d = x[None, :] if squeeze else x
    B, K = x2d.shape
    N, Kw = w1.shape
    assert K == Kw and w2.shape == (N, K)

    # Weights are static module parameters: fuse the two heads and pre-transpose
    # once on the host side (constant-folded under jit). Shape: (K, 2N).
    w_fused = jnp.concatenate([w1, w2], axis=0).T

    # Pad the output/lane dimension up to a multiple of 128 so the kernel's
    # output store is lane-dense (single unmasked vst slab instead of two
    # masked N=16 partial stores). Extra columns are zeros and sliced off below.
    n_pad = max(_LANE, ((2 * N + _LANE - 1) // _LANE) * _LANE)
    if n_pad != 2 * N:
        w_fused = jnp.pad(w_fused, ((0, 0), (0, n_pad - 2 * N)))

    itemsize = jnp.dtype(x2d.dtype).itemsize
    cost = pl.CostEstimate(
        flops=2 * B * (2 * N) * K,
        transcendentals=0,
        bytes_accessed=(x2d.size + w_fused.size + B * n_pad) * itemsize,
    )

    # Everything fits a single VMEM block at these sizes: no grid.
    # TODO(synk): if B/K/N ever grow, add a grid over B (>=512-row tiles, or
    # 128-multiples on v5e) with dimension_semantics=("parallel",) and re-derive
    # VMEM budget for v7x (64 MiB).
    y = pl.pallas_call(
        _two_head_fused_kernel,
        out_shape=jax.ShapeDtypeStruct((B, n_pad), x2d.dtype),
        in_specs=[
            pl.BlockSpec(memory_space=pltpu.VMEM),
            pl.BlockSpec(memory_space=pltpu.VMEM),
        ],
        out_specs=pl.BlockSpec(memory_space=pltpu.VMEM),
        cost_estimate=cost,
        compiler_params=pltpu.CompilerParams(
            vmem_limit_bytes=32 * 1024 * 1024,
        ),
    )(x2d, w_fused)

    # Split the fused output back into the two heads (static lane slices).
    y1 = y[:, :N]
    y2 = y[:, N : 2 * N]
    if squeeze:
        y1 = y1[0]
        y2 = y2[0]
    return y1, y2


if __name__ == "__main__":
    in_features = 32
    out_features = 16

    key = jax.random.PRNGKey(0)
    kx, kw1, kw2 = jax.random.split(key, 3)

    # Deterministic "custom weights" (stand-ins for weights1 / weights2 in __init__).
    w1 = jax.random.normal(kw1, (out_features, in_features), dtype=jnp.float32)
    w2 = jax.random.normal(kw2, (out_features, in_features), dtype=jnp.float32)

    # Forward-pass input: shape (in_features,) as documented by the module.
    x = jax.random.normal(kx, (in_features,), dtype=jnp.float32)

    y1, y2 = two_head_linear(x, w1, w2)
    jax.block_until_ready((y1, y2))

    # Correctness check against plain-JAX reference (nn.Linear semantics: x @ W.T).
    ref1 = x @ w1.T
    ref2 = x @ w2.T
    assert y1.shape == (out_features,) and y2.shape == (out_features,)
    assert jnp.allclose(y1, ref1, atol=1e-5, rtol=1e-5)
    assert jnp.allclose(y2, ref2, atol=1e-5, rtol=1e-5)

    # Also check a small batched input (B, in_features) path.
    xb = jax.random.normal(jax.random.PRNGKey(1), (4, in_features), dtype=jnp.float32)
    yb1, yb2 = two_head_linear(xb, w1, w2)
    jax.block_until_ready((yb1, yb2))
    assert jnp.allclose(yb1, xb @ w1.T, atol=1e-5, rtol=1e-5)
    assert jnp.allclose(yb2, xb @ w2.T, atol=1e-5, rtol=1e-5)

    print("KERNEL_OK")
</pallas_src>

<mosaic_0001>
module attributes {stable_mosaic.version = 11 : i64} {
  func.func @_two_head_fused_kernel(%arg0: memref<1x32xf32, #tpu.memory_space<vmem>>, %arg1: memref<32x128xf32, #tpu.memory_space<vmem>>, %arg2: memref<1x128xf32, #tpu.memory_space<vmem>>) attributes {dimension_semantics = [], scalar_prefetch = 0 : i64, scratch_operands = 0 : i64, tpu.core_type = #tpu.core_type<tc>} {
    %c0 = arith.constant 0 : index
    %c0_0 = arith.constant 0 : index
    %0 = vector.load %arg0[%c0, %c0_0] : memref<1x32xf32, #tpu.memory_space<vmem>>, vector<1x32xf32>
    %c0_1 = arith.constant 0 : index
    %c0_2 = arith.constant 0 : index
    %1 = vector.load %arg1[%c0_1, %c0_2] : memref<32x128xf32, #tpu.memory_space<vmem>>, vector<32x128xf32>
    %cst = arith.constant dense<0.000000e+00> : vector<1x128xf32>
    %2 = tpu.matmul %0, %1, %cst {dimension_numbers = #tpu.dot_dimension_numbers<[1], [0], [0], [1], [0, 0, 1, 1], [], []>} : vector<1x32xf32>, vector<32x128xf32>, vector<1x128xf32> -> vector<1x128xf32>
    %c0_3 = arith.constant 0 : index
    %c0_4 = arith.constant 0 : index
    %3 = vector.load %arg2[%c0_3, %c0_4] : memref<1x128xf32, #tpu.memory_space<vmem>>, vector<1x128xf32>
    tpu.vector_store %arg2[%c0_3, %c0_4], %2 {strides = array<i32>} : memref<1x128xf32, #tpu.memory_space<vmem>>, vector<1x128xf32>,
    return
  }
}

</mosaic_0001>

<bundles_post_ra>
// kernel: tpu_custom_call.1
= control target key start
LH: loop header
LB: loop body
LE: loop exit
PB: predicated region body
PF: predicated region fallthrough
CT: control target
= control target key end

     0   :  { %7 = vsyncpa [#allocation3], 0  ;;  %s303_s0 = inlined_call_operand.hbm [shape: f32[1,32], index: 0, kind: input, shape index: {}]   ;;  %s304_s1 = inlined_call_operand.hbm [shape: f32[32,128], index: 1, kind: input, shape index: {}]   ;;  %s305_s2 = inlined_call_operand.hbm [shape: f32[1,128], index: 2, kind: output, shape index: {}]  }
   0x1   :  { %8 = vsyncpa [#allocation6], 0 }
   0x2   :  { %9 = vsyncpa [#allocation4], 0  ;;  %s237_s9 = smov [#allocation2]   ;;  %s238_s11 = smov [#allocation5]  }
   0x3   :  { %s16_s10 = sshll.u32 %s237_s9, 4  ;;  %s25_s12 = sshll.u32 %s238_s11, 4  ;;  %s17_s10 = int_to_ptr.vmem [resolvable:$true] %s16_s10  ;;  %s260_s12 = int_to_ptr.vmem [resolvable:$true] %s25_s12 }
   0x4   :  { %s165_s15 = scalar_lea.hbm %s303_s0, 16 }
   0x5   :  { %p166_p0 = scmp.ne.s32.totalorder %s303_s0, %s165_s15  ;;  %p169_p1 = scmp.lt.u32.totalorder %s165_s15, %s303_s0 }
   0x7   :  { %p171_p2 = pnand %p169_p1, %p166_p0 }
   0x9   :  { %174 = shalt.err (!%p171_p2)
}
   0xa   :  { %s175_s20 = scalar_lea.vmem %s17_s10, 16  ;;  %s179_s21 = scalar_lea.vmem %s17_s10, 32 }
   0xb   :  { %p176_p3 = scmp.ne.s32.totalorder %s17_s10, %s175_s20  ;;  %p180_p4 = scmp.lt.s32.totalorder %s17_s10, %s17_s10 }
   0xc   :  { %p181_p5 = scmp.lt.s32.totalorder %s179_s21, %s175_s20 }
   0xe   :  { %p182_p6 = por %p181_p5, %p180_p4 }
  0x10   :  { %p183_p7 = pnand %p182_p6, %p176_p3 }
  0x12   :  { %186 = shalt.err (!%p183_p7)
}
  0x13   :  { %19 = dma.hbm_to_vmem [thread:$0]  %s303_s0, 16, %s17_s10, [#allocation3]  }
  0x14   :  { %s187_s26 = scalar_lea.hbm %s304_s1, 512 }
  0x15   :  { %p188_p8 = scmp.ne.s32.totalorder %s304_s1, %s187_s26  ;;  %p191_p9 = scmp.lt.u32.totalorder %s187_s26, %s304_s1 }
  0x17   :  { %p193_p10 = pnand %p191_p9, %p188_p8 }
  0x19   :  { %196 = shalt.err (!%p193_p10)
}
  0x1a   :  { %s197_s3 = scalar_lea.vmem %s260_s12, 512  ;;  %p202_p12 = scmp.lt.s32.totalorder %s260_s12, %s260_s12 }
  0x1b   :  { %p198_p11 = scmp.ne.s32.totalorder %s260_s12, %s197_s3  ;;  %p203_p13 = scmp.lt.s32.totalorder %s197_s3, %s197_s3 }
  0x1d   :  { %p204_p0 = por %p203_p13, %p202_p12 }
  0x1f   :  { %p205_p1 = pnand %p204_p0, %p198_p11 }
  0x21   :  { %208 = shalt.err (!%p205_p1)
}
  0x22   :  { %s239_s0 = smov 128   ;;  %s240_s4 = smov 8  }
  0x23   :  { %31 = dma.hbm_to_vmem [thread:$0]  %s304_s1, 512, %s260_s12, [#allocation6], %s239_s0, %s239_s0, %s240_s4  }
  0x24   :  { %231 = dma.done.wait [#allocation3], 16  }
  0x25   :  { %232 = vsyncadd [#allocation3], 4294967280 }
  0x26   :  { %233 = dma.done.wait [#allocation6], 512  }
  0x27   :  { %234 = vsyncadd [#allocation6], 4294966784  ;;  %v241_v0 = vmov 0.0|0.0   ;;  %vm242_vm0 = vmmov 0   ;;  %v243_v1 = vmov 0.0   ;;  %v39_v2 = vld [vmem:[#allocation5] sm:$0xff] }
  0x28   :  { %151 = vmatprep.subr.bf16.mxu0 %v241_v0  ;;  %148 = vmatprep.mubr.msk.f32.mxu0 %vm242_vm0, %v243_v1  ;;  %v40_v3 = vld [vmem:[#allocation5 + $0x8] sm:$0xff]  ;;  %v41_v4 = vld [vmem:[#allocation5 + $0x10] sm:$0xff]  ;;  %v42_v6 = vld [vmem:[#allocation5 + $0x18] sm:$0xff]  ;;  %vm43_vm1 = vcmask 261120   ;;  %s244_s1 = smov [#allocation7]  }
  0x29   :  { %v152_v5 = vpack.c.bf16 %v40_v3, %v39_v2  ;;  %v155_v7 = vpack.c.bf16 %v42_v6, %v41_v4  ;;  %v38_v8 = vld [vmem:[#allocation2] sm:$0x1]  ;;  %s124_s7 = sshll.u32 %s244_s1, 4  ;;  %s125_s7 = int_to_ptr.vmem [resolvable:$true] %s124_s7 }
  0x2a   :  { %s209_s8 = scalar_lea.vmem %s125_s7, 16  ;;  %s213_s9 = scalar_lea.vmem %s125_s7, 32 }
  0x2b   :  { %153 = vmatpush3.bf16.msra.mxu0 %v152_v5  ;;  %p210_p2 = scmp.ne.s32.totalorder %s125_s7, %s209_s8  ;;  %p214_p3 = scmp.lt.s32.totalorder %s125_s7, %s125_s7 }
  0x2c   :  { %154 = vmatprep.subr.bf16.mxu0 %v241_v0  ;;  %p215_p4 = scmp.lt.s32.totalorder %s213_s9, %s209_s8 }
  0x2e   :  { %p216_p5 = por %p215_p4, %p214_p3 }
  0x2f   :  { %156 = vmatpush3.bf16.msra.mxu0 %v155_v7 }
  0x30   :  { %p217_p6 = pnand %p216_p5, %p210_p2 }
  0x32   :  { %149 = vmatmul.mubr.msk.f32.vlgmr.msra.gmra.mrb[0].mxu0 %vm43_vm1, %v38_v8 }
 0x105   :  { %v113_v9 = vpop.f32.mrb[0].mxu0 }
 0x106   :  { %117 = vst [vmem:[#allocation7] sm:$0x1] %v113_v9  ;;  %v150_v10 = vpop.f32.mrb[1].mxu0 }
 0x107   :  { %220 = shalt.err (!%p217_p6)
}
 0x108   :  { %s221_s12 = scalar_lea.hbm %s305_s2, 16 }
 0x109   :  { %p222_p7 = scmp.ne.s32.totalorder %s305_s2, %s221_s12  ;;  %p225_p8 = scmp.lt.u32.totalorder %s221_s12, %s305_s2 }
 0x10b   :  { %p227_p9 = pnand %p225_p8, %p222_p7 }
 0x10d   :  { %230 = shalt.err (!%p227_p9)
}
 0x10e   :  { %127 = dma.vmem_to_hbm [thread:$0]  %s125_s7, 16, %s305_s2, [#allocation4]  }
 0x10f   :  { %235 = dma.done.wait [#allocation4], 16  }
 0x110   :  { %236 = vsyncadd [#allocation4], 4294967280 }
 0x111   :  { %131 = vsyncpa [#allocation3], 1 }
 0x112   :  { %132 = vsyncpa [#allocation6], 1 }
 0x113   :  { %133 = vsyncpa [#allocation4], 1 }

</bundles_post_ra>
